<compile_context>
chip_gen: v7x
topology: tpu7x:2x2x1
jax: 0.10.0
libtpu: 0.0.40
codegen_flags: <defaults>
</compile_context>

<pallas_src>
import jax
import jax.numpy as jnp
from jax.experimental import pallas as pl
from jax.experimental.pallas import tpu as pltpu

_SUM_BLOCK_ELEMS = 1024 * 1024   # ~4 MiB f32 per input block (reduce path)
_ELEM_BLOCK_ELEMS = 512 * 1024   # ~2 MiB f32 per input block ('none' path)
_VMEM_LIMIT = 32 * 1024 * 1024   # scoped VMEM; safe on v5e / v6e / v7x


def _qfocal_elem(pred, true, *, alpha, gamma):
    """Elementwise QFocalLoss (f32 in / f32 out). Pure jnp, usable in & out of kernel."""
    # Stable BCEWithLogits(reduction='none'):
    #   bce = max(p,0) - p*y + log1p(exp(-|p|))
    # Reuse e = exp(-|p|) for the sigmoid too (one exp instead of two):
    #   sigmoid(p) = 1/(1+e)  if p >= 0   else   e/(1+e)
    e = jnp.exp(-jnp.abs(pred))
    bce = jnp.maximum(pred, 0.0) - pred * true + jnp.log1p(e)
    inv = 1.0 / (1.0 + e)
    pred_prob = jnp.where(pred >= 0.0, inv, e * inv)
    alpha_factor = true * alpha + (1.0 - true) * (1.0 - alpha)
    d = jnp.abs(true - pred_prob)
    if gamma == 1.5:                       # default gamma: exact, no pow()
        modulating = d * jnp.sqrt(d)
    else:
        modulating = jnp.power(d, gamma)
    return bce * alpha_factor * modulating


def _choose_width(n_main):
    """Largest lane width in {1024,...,128} dividing n_main; prefer >= 8 rows."""
    if n_main == 0:
        return 0
    for w in (1024, 512, 256, 128):
        if n_main % w == 0 and (n_main // w >= 8 or w == 128):
            return w
    for w in (1024, 512, 256, 128):        # tiny inputs: any divisor
        if n_main % w == 0:
            return w
    return 0


def _choose_block_rows(rows, width, target_elems):
    """Block rows: multiple of 8 (or full dim), >= 2 grid steps when possible."""
    if rows <= 8:
        return rows
    target_r = max(8, (target_elems // width) // 8 * 8)
    cap = (rows // 8) * 8                  # multiple of 8, <= rows
    block_r = min(target_r, cap)
    if -(-rows // block_r) < 2:            # give the 'parallel' axis >= 2 tiles (v7x megacore)
        half = max(8, (((rows + 1) // 2) + 7) // 8 * 8)
        block_r = min(block_r, half)
    return block_r


def _make_sum_kernel(*, alpha, gamma, tail_rows, block_r, width):
    full = (tail_rows == block_r)
    part_rows = 8 if block_r % 8 == 0 else block_r

    def compute(pred_ref, true_ref, masked):
        p = pred_ref[...].astype(jnp.float32)
        y = true_ref[...].astype(jnp.float32)
        if masked:
            r = jax.lax.broadcasted_iota(jnp.int32, p.shape, 0)
            valid = r < tail_rows          # ragged rows only (width always divides n_main)
            p = jnp.where(valid, p, 0.0)   # sanitize garbage rows of the partial block
            y = jnp.where(valid, y, 0.0)
            loss = jnp.where(valid, _qfocal_elem(p, y, alpha=alpha, gamma=gamma), 0.0)
        else:
            loss = _qfocal_elem(p, y, alpha=alpha, gamma=gamma)
        if block_r % 8 == 0:
            # Fold sublane-groups with plain VPU adds; store a full (8,width) tile.
            part = jnp.sum(loss.reshape(block_r // 8, 8, width), axis=0)
        else:
            part = loss                    # tiny single-tile case (rows < 8)
        return part

    def kernel(pred_ref, true_ref, part_ref):
        if full:                           # aligned: no masked branch at all
            part_ref[...] = compute(pred_ref, true_ref, False)[None]
        else:
            t = pl.program_id(0)
            last = pl.num_programs(0) - 1

            @pl.when(t != last)
            def _():
                part_ref[...] = compute(pred_ref, true_ref, False)[None]

            @pl.when(t == last)
            def _():
                part_ref[...] = compute(pred_ref, true_ref, True)[None]

    return kernel, part_rows


def _make_elem_kernel(*, alpha, gamma):
    def kernel(pred_ref, true_ref, out_ref):
        p = pred_ref[...].astype(jnp.float32)
        y = true_ref[...].astype(jnp.float32)
        out_ref[...] = _qfocal_elem(p, y, alpha=alpha, gamma=gamma).astype(out_ref.dtype)
    return kernel


def qfocal_loss(pred, true, gamma=1.5, alpha=0.25, reduction="mean"):
    orig_shape = pred.shape
    orig_dtype = pred.dtype
    n = pred.size
    if n == 0:
        if reduction == "none":
            return jnp.zeros(orig_shape, orig_dtype)
        if reduction == "sum":
            return jnp.float32(0.0)
        return jnp.float32(jnp.nan)        # torch: mean of an empty tensor is NaN

    gamma = float(gamma)
    alpha = float(alpha)

    p_flat = pred.reshape(-1)              # keep original dtype; no up-cast copy
    y_flat = true.reshape(-1)

    # ---- lane-dense layout with NO padding copy ---------------------------
    n_tail = n % 128
    n_main = n - n_tail
    width = _choose_width(n_main)

    # sub-width tail (< 128 elems): plain jnp, negligible cost
    if n_tail:
        tail_loss = _qfocal_elem(p_flat[n_main:].astype(jnp.float32),
                                 y_flat[n_main:].astype(jnp.float32),
                                 alpha=alpha, gamma=gamma)
    else:
        tail_loss = None

    if n_main == 0:                        # everything fits in the tail (< 128 elems)
        if reduction == "mean":
            return jnp.sum(tail_loss) / jnp.float32(n)
        if reduction == "sum":
            return jnp.sum(tail_loss)
        return tail_loss.astype(orig_dtype).reshape(orig_shape)

    rows = n_main // width
    if n_tail:
        p2 = p_flat[:n_main].reshape(rows, width)
        y2 = y_flat[:n_main].reshape(rows, width)
    else:                                  # free reshape, zero copies
        p2 = p_flat.reshape(rows, width)
        y2 = y_flat.reshape(rows, width)

    cparams = pltpu.CompilerParams(dimension_semantics=("parallel",),
                                   vmem_limit_bytes=_VMEM_LIMIT)

    if reduction in ("mean", "sum"):
        block_r = _choose_block_rows(rows, width, _SUM_BLOCK_ELEMS)
        num_tiles = -(-rows // block_r)
        tail_rows = rows - (num_tiles - 1) * block_r
        kernel, part_rows = _make_sum_kernel(alpha=alpha, gamma=gamma,
                                             tail_rows=tail_rows,
                                             block_r=block_r, width=width)
        partials = pl.pallas_call(
            kernel,
            out_shape=jax.ShapeDtypeStruct((num_tiles, part_rows, width), jnp.float32),
            grid_spec=pltpu.PrefetchScalarGridSpec(
                num_scalar_prefetch=0,
                grid=(num_tiles,),
                in_specs=[pl.BlockSpec((block_r, width), lambda t: (t, 0)),
                          pl.BlockSpec((block_r, width), lambda t: (t, 0))],
                out_specs=pl.BlockSpec((1, part_rows, width), lambda t: (t, 0, 0)),
            ),
            compiler_params=cparams,
        )(p2, y2)
        total = jnp.sum(partials)
        if tail_loss is not None:
            total = total + jnp.sum(tail_loss)
        if reduction == "mean":
            return total / jnp.float32(n)
        return total

    # ---- reduction == 'none': elementwise loss ----------------------------
    block_r = _choose_block_rows(rows, width, _ELEM_BLOCK_ELEMS)
    num_tiles = -(-rows // block_r)
    kernel = _make_elem_kernel(alpha=alpha, gamma=gamma)
    out_main = pl.pallas_call(
        kernel,
        out_shape=jax.ShapeDtypeStruct((rows, width), orig_dtype),
        grid_spec=pltpu.PrefetchScalarGridSpec(
            num_scalar_prefetch=0,
            grid=(num_tiles,),
            in_specs=[pl.BlockSpec((block_r, width), lambda t: (t, 0)),
                      pl.BlockSpec((block_r, width), lambda t: (t, 0))],
            out_specs=pl.BlockSpec((block_r, width), lambda t: (t, 0)),
        ),
        compiler_params=cparams,
    )(p2, y2)
    if tail_loss is None:
        return out_main.reshape(orig_shape)       # aligned: no post-slice copy
    return jnp.concatenate(
        [out_main.reshape(-1), tail_loss.astype(orig_dtype)]).reshape(orig_shape)


def _qfocal_reference(pred, true, gamma=1.5, alpha=0.25, reduction="mean"):
    pred = pred.astype(jnp.float32)
    true = true.astype(jnp.float32)
    bce = jnp.maximum(pred, 0.0) - pred * true + jnp.log1p(jnp.exp(-jnp.abs(pred)))
    pred_prob = jax.nn.sigmoid(pred)
    alpha_factor = true * alpha + (1.0 - true) * (1.0 - alpha)
    modulating = jnp.abs(true - pred_prob) ** gamma
    loss = bce * alpha_factor * modulating
    if reduction == "mean":
        return jnp.mean(loss)
    if reduction == "sum":
        return jnp.sum(loss)
    return loss


if __name__ == "__main__":
    key = jax.random.PRNGKey(0)
    k1, k2, k3, k4 = jax.random.split(key, 4)

    # primary check: small NCHW logits / targets, reduction='mean' (module default)
    pred = jax.random.normal(k1, (2, 4, 16, 16), dtype=jnp.float32)
    true = jax.random.uniform(k2, (2, 4, 16, 16), dtype=jnp.float32)
    out = jax.block_until_ready(qfocal_loss(pred, true))
    ref = jax.block_until_ready(_qfocal_reference(pred, true))
    assert jnp.allclose(out, ref, rtol=2e-4, atol=1e-6), (out, ref)

    # ragged-tail / multi-tile paths + 'sum' + 'none'
    pred_r = jax.random.normal(k3, (3, 7, 31, 29), dtype=jnp.float32)
    true_r = jax.random.uniform(k4, (3, 7, 31, 29), dtype=jnp.float32)
    for red, rtol, atol in (("mean", 5e-4, 1e-6), ("sum", 5e-4, 1e-2), ("none", 2e-4, 1e-6)):
        o = jax.block_until_ready(qfocal_loss(pred_r, true_r, reduction=red))
        r = jax.block_until_ready(_qfocal_reference(pred_r, true_r, reduction=red))
        assert jnp.allclose(o, r, rtol=rtol, atol=atol), (red, o, r)

    # bf16 inputs (kernel computes in f32 internally)
    out_b = jax.block_until_ready(qfocal_loss(pred.astype(jnp.bfloat16),
                                              true.astype(jnp.bfloat16)))
    ref_b = jax.block_until_ready(_qfocal_reference(pred.astype(jnp.bfloat16),
                                                    true.astype(jnp.bfloat16)))
    assert jnp.allclose(out_b, ref_b, rtol=1e-3, atol=1e-5), (out_b, ref_b)

    print("KERNEL_OK")
</pallas_src>

<mosaic_0001>
module attributes {stable_mosaic.version = 11 : i64} {
  func.func @kernel(%arg0: i32, %arg1: memref<8x256xf32, #tpu.memory_space<vmem>>, %arg2: memref<8x256xf32, #tpu.memory_space<vmem>>, %arg3: memref<1x8x256xf32, #tpu.memory_space<vmem>>) attributes {dimension_semantics = [#tpu.dimension_semantics<parallel>], iteration_bounds = array<i64: 1>, scalar_prefetch = 0 : i64, scratch_operands = 0 : i64, tpu.core_type = #tpu.core_type<tc>, window_params = [{transform_indices = @transform_0, window_bounds = array<i64: 8, 256>}, {transform_indices = @transform_1, window_bounds = array<i64: 8, 256>}, {transform_indices = @transform_2, window_bounds = array<i64: 1, 8, 256>}]} {
    %c0 = arith.constant 0 : index
    %c0_0 = arith.constant 0 : index
    %0 = vector.load %arg1[%c0, %c0_0] : memref<8x256xf32, #tpu.memory_space<vmem>>, vector<8x256xf32>
    %c0_1 = arith.constant 0 : index
    %c0_2 = arith.constant 0 : index
    %1 = vector.load %arg2[%c0_1, %c0_2] : memref<8x256xf32, #tpu.memory_space<vmem>>, vector<8x256xf32>
    %2 = math.absf %0 : vector<8x256xf32>
    %cst = arith.constant 0.000000e+00 : f32
    %3 = vector.broadcast %cst : f32 to vector<8x256xf32>
    %4 = arith.subf %3, %2 : vector<8x256xf32>
    %5 = math.exp %4 : vector<8x256xf32>
    %cst_3 = arith.constant 0.000000e+00 : f32
    %6 = vector.broadcast %cst_3 : f32 to vector<8x256xf32>
    %7 = arith.maximumf %0, %6 : vector<8x256xf32>
    %8 = arith.mulf %0, %1 : vector<8x256xf32>
    %9 = arith.subf %7, %8 : vector<8x256xf32>
    %10 = math.log1p %5 : vector<8x256xf32>
    %11 = arith.addf %9, %10 : vector<8x256xf32>
    %cst_4 = arith.constant 1.000000e+00 : f32
    %12 = vector.broadcast %cst_4 : f32 to vector<8x256xf32>
    %13 = arith.addf %12, %5 : vector<8x256xf32>
    %cst_5 = arith.constant 1.000000e+00 : f32
    %14 = vector.broadcast %cst_5 : f32 to vector<8x256xf32>
    %15 = arith.divf %14, %13 : vector<8x256xf32>
    %cst_6 = arith.constant 0.000000e+00 : f32
    %16 = vector.broadcast %cst_6 : f32 to vector<8x256xf32>
    %17 = arith.cmpf oge, %0, %16 : vector<8x256xf32>
    %18 = arith.mulf %5, %15 : vector<8x256xf32>
    %19 = arith.select %17, %15, %18 : vector<8x256xi1>, vector<8x256xf32>
    %cst_7 = arith.constant 2.500000e-01 : f32
    %20 = vector.broadcast %cst_7 : f32 to vector<8x256xf32>
    %21 = arith.mulf %1, %20 : vector<8x256xf32>
    %cst_8 = arith.constant 1.000000e+00 : f32
    %22 = vector.broadcast %cst_8 : f32 to vector<8x256xf32>
    %23 = arith.subf %22, %1 : vector<8x256xf32>
    %cst_9 = arith.constant 7.500000e-01 : f32
    %24 = vector.broadcast %cst_9 : f32 to vector<8x256xf32>
    %25 = arith.mulf %23, %24 : vector<8x256xf32>
    %26 = arith.addf %21, %25 : vector<8x256xf32>
    %27 = arith.subf %1, %19 : vector<8x256xf32>
    %28 = math.absf %27 : vector<8x256xf32>
    %29 = math.sqrt %28 : vector<8x256xf32>
    %30 = arith.mulf %28, %29 : vector<8x256xf32>
    %31 = arith.mulf %11, %26 : vector<8x256xf32>
    %32 = arith.mulf %31, %30 : vector<8x256xf32>
    %33 = vector.shape_cast %32 : vector<8x256xf32> to vector<1x8x256xf32>
    %cst_10 = arith.constant dense<0.000000e+00> : vector<8x256xf32>
    %34 = vector.multi_reduction <add>, %33, %cst_10 [0] : vector<1x8x256xf32> to vector<8x256xf32>
    %35 = vector.shape_cast %34 : vector<8x256xf32> to vector<1x8x256xf32>
    %c0_11 = arith.constant 0 : index
    %c0_12 = arith.constant 0 : index
    %c0_13 = arith.constant 0 : index
    %36 = vector.load %arg3[%c0_11, %c0_12, %c0_13] : memref<1x8x256xf32, #tpu.memory_space<vmem>>, vector<1x8x256xf32>
    tpu.vector_store %arg3[%c0_11, %c0_12, %c0_13], %35 {strides = array<i32>} : memref<1x8x256xf32, #tpu.memory_space<vmem>>, vector<1x8x256xf32>,
    return
  }
  func.func @transform_0(%arg0: i32) -> (i32, i32) {
    %c0_i32 = arith.constant 0 : i32
    %c0_i32_0 = arith.constant 0 : i32
    return %arg0, %c0_i32 : i32, i32
  }
  func.func @transform_1(%arg0: i32) -> (i32, i32) {
    %c0_i32 = arith.constant 0 : i32
    %c0_i32_0 = arith.constant 0 : i32
    return %arg0, %c0_i32 : i32, i32
  }
  func.func @transform_2(%arg0: i32) -> (i32, i32, i32) {
    %c0_i32 = arith.constant 0 : i32
    %c0_i32_0 = arith.constant 0 : i32
    %c0_i32_1 = arith.constant 0 : i32
    return %arg0, %c0_i32, %c0_i32_0 : i32, i32, i32
  }
}

</mosaic_0001>

<bundles_post_ra>
// kernel: tpu_custom_call.1
= control target key start
LH: loop header
LB: loop body
LE: loop exit
PB: predicated region body
PF: predicated region fallthrough
CT: control target
= control target key end

     0   :  { %7 = vsyncpa [#allocation3], 0  ;;  %s283_s0 = inlined_call_operand.hbm [shape: f32[8,256], index: 0, kind: input, shape index: {}]   ;;  %s284_s1 = inlined_call_operand.hbm [shape: f32[8,256], index: 1, kind: input, shape index: {}]   ;;  %s285_s2 = inlined_call_operand.hbm [shape: f32[1,8,256], index: 2, kind: output, shape index: {}]  }
   0x1   :  { %8 = vsyncpa [#allocation6], 0 }
   0x2   :  { %9 = vsyncpa [#allocation4], 0  ;;  %s229_s9 = smov [#allocation2]   ;;  %s230_s11 = smov [#allocation5]  }
   0x3   :  { %s16_s10 = sshll.u32 %s229_s9, 4  ;;  %s26_s12 = sshll.u32 %s230_s11, 4  ;;  %s17_s10 = int_to_ptr.vmem [resolvable:$true] %s16_s10  ;;  %s27_s12 = int_to_ptr.vmem [resolvable:$true] %s26_s12 }
   0x4   :  { %s157_s15 = scalar_lea.hbm %s283_s0, 256 }
   0x5   :  { %p158_p0 = scmp.ne.s32.totalorder %s283_s0, %s157_s15  ;;  %p161_p1 = scmp.lt.u32.totalorder %s157_s15, %s283_s0 }
   0x7   :  { %p163_p2 = pnand %p161_p1, %p158_p0 }
   0x9   :  { %166 = shalt.err (!%p163_p2)
}
   0xa   :  { %s167_s20 = scalar_lea.vmem %s17_s10, 256  ;;  %p172_p4 = scmp.lt.s32.totalorder %s17_s10, %s17_s10 }
   0xb   :  { %p168_p3 = scmp.ne.s32.totalorder %s17_s10, %s167_s20  ;;  %p173_p5 = scmp.lt.s32.totalorder %s167_s20, %s167_s20 }
   0xd   :  { %p174_p6 = por %p173_p5, %p172_p4 }
   0xf   :  { %p175_p7 = pnand %p174_p6, %p168_p3 }
  0x11   :  { %178 = shalt.err (!%p175_p7)
}
  0x12   :  { %19 = dma.hbm_to_vmem [thread:$0]  %s283_s0, 256, %s17_s10, [#allocation3]  }
  0x13   :  { %s179_s25 = scalar_lea.hbm %s284_s1, 256 }
  0x14   :  { %p180_p8 = scmp.ne.s32.totalorder %s284_s1, %s179_s25  ;;  %p183_p9 = scmp.lt.u32.totalorder %s179_s25, %s284_s1 }
  0x16   :  { %p185_p10 = pnand %p183_p9, %p180_p8 }
  0x18   :  { %188 = shalt.err (!%p185_p10)
}
  0x19   :  { %s189_s30 = scalar_lea.vmem %s27_s12, 256  ;;  %p194_p12 = scmp.lt.s32.totalorder %s27_s12, %s27_s12 }
  0x1a   :  { %p190_p11 = scmp.ne.s32.totalorder %s27_s12, %s189_s30  ;;  %p195_p13 = scmp.lt.s32.totalorder %s189_s30, %s189_s30 }
  0x1c   :  { %p196_p0 = por %p195_p13, %p194_p12 }
  0x1e   :  { %p197_p1 = pnand %p196_p0, %p190_p11 }
  0x20   :  { %200 = shalt.err (!%p197_p1)
}
  0x21   :  { %29 = dma.hbm_to_vmem [thread:$0]  %s284_s1, 256, %s27_s12, [#allocation6]  }
  0x22   :  { %223 = dma.done.wait [#allocation3], 256  }
  0x23   :  { %224 = vsyncadd [#allocation3], 4294967040 }
  0x24   :  { %225 = dma.done.wait [#allocation6], 256  }
  0x25   :  { %226 = vsyncadd [#allocation6], 4294967040  ;;  %v36_v0 = vld [vmem:[#allocation2] sm:$0xff]  ;;  %v37_v1 = vld [vmem:[#allocation2 + $0x8] sm:$0xff]  ;;  %s231_s1 = smov [#allocation7]  }
  0x26   :  { %v40_v2 = vand.u32 2147483647, %v36_v0  ;;  %v41_v3 = vand.u32 2147483647, %v37_v1  ;;  %vm80_vm0 = vcmp.ge.f32.partialorder %v36_v0, 0.0  ;;  %v38_v13 = vld [vmem:[#allocation5] sm:$0xff] }
  0x27   :  { %vm81_vm1 = vcmp.ge.f32.partialorder %v37_v1, 0.0  ;;  %v39_v18 = vld [vmem:[#allocation5 + $0x8] sm:$0xff]  ;;  %v48_v28 = vmax.f32 %v36_v0, 0.0  ;;  %v50_v29 = vmul.f32 %v38_v13, %v36_v0  ;;  %v88_v30 = vsub.f32 1.0, %v38_v13  ;;  %s128_s4 = sshll.u32 %s231_s1, 4  ;;  %s129_s4 = int_to_ptr.vmem [resolvable:$true] %s128_s4 }
  0x28   :  { %v42_v4 = vsub.f32 0.0, %v40_v2  ;;  %v43_v5 = vsub.f32 0.0, %v41_v3  ;;  %v86_v37 = vmul.f32 0.25, %v38_v13  ;;  %v49_v38 = vmax.f32 %v37_v1, 0.0  ;;  %s201_s5 = scalar_lea.vmem %s129_s4, 256  ;;  %p206_p3 = scmp.lt.s32.totalorder %s129_s4, %s129_s4 }
  0x29   :  { %v51_v39 = vmul.f32 %v39_v18, %v37_v1  ;;  %v89_v40 = vsub.f32 1.0, %v39_v18  ;;  %v52_v41 = vsub.f32 %v48_v28, %v50_v29  ;;  %v90_v42 = vmul.f32 0.75, %v88_v30  ;;  %p202_p2 = scmp.ne.s32.totalorder %s129_s4, %s201_s5  ;;  %p207_p4 = scmp.lt.s32.totalorder %s201_s5, %s201_s5 }
  0x2a   :  { %v44_v6 = vmul.f32 1.442695, %v42_v4  ;;  %v46_v7 = vmul.f32 1.442695, %v43_v5  ;;  %v87_v47 = vmul.f32 0.25, %v39_v18 }
  0x2b   :  { %v53_v46 = vsub.f32 %v49_v38, %v51_v39  ;;  %v91_v48 = vmul.f32 0.75, %v89_v40  ;;  %v92_v50 = vadd.f32 %v90_v42, %v86_v37  ;;  %p208_p5 = por %p207_p4, %p206_p3 }
  0x2c   :  { %141 = vpow2.f32 %v44_v6 }
  0x2d   :  { %143 = vpow2.f32 %v46_v7  ;;  %v93_v56 = vadd.f32 %v91_v48, %v87_v47  ;;  %p209_p6 = pnand %p208_p5, %p202_p2 }
  0x36   :  { %v142_v8 = vpop.eup %141 }
  0x37   :  { %v144_v9 = vpop.eup %143  ;;  %v54_v10 = vadd.f32 1.0, %v142_v8  ;;  %v57_v16 = vmul.f32 -0.5, %v142_v8  ;;  %v60_v27 = vand.u32 2147483647, %v142_v8 }
  0x38   :  { %v63_v11 = vadd.f32 1.0, %v144_v9  ;;  %v66_v21 = vmul.f32 -0.5, %v144_v9  ;;  %v69_v36 = vand.u32 2147483647, %v144_v9 }
  0x39   :  { %145 = vrcp.f32 %v54_v10  ;;  %v58_v23 = vadd.f32 1.0, %v57_v16  ;;  %vm61_vm2 = vcmp.lt.f32.partialorder %v60_v27, 0.0004427343 }
  0x3a   :  { %147 = vrcp.f32 %v63_v11  ;;  %v67_v31 = vadd.f32 1.0, %v66_v21  ;;  %vm70_vm3 = vcmp.lt.f32.partialorder %v69_v36, 0.0004427343 }
  0x3b   :  { %149 = vlog2.f32 %v54_v10  ;;  %v59_v35 = vmul.f32 %v142_v8, %v58_v23 }
  0x3c   :  { %151 = vlog2.f32 %v63_v11  ;;  %v68_v44 = vmul.f32 %v144_v9, %v67_v31 }
  0x43   :  { %v146_v12 = vpop.eup %145 }
  0x44   :  { %v82_v14 = vmul.f32 %v146_v12, %v142_v8  ;;  %v148_v15 = vpop.eup %147 }
  0x45   :  { %v83_v19 = vmul.f32 %v148_v15, %v144_v9  ;;  %v150_v26 = vpop.eup %149 }
  0x46   :  { %v84_v17 = vsel %vm80_vm0, %v146_v12, %v82_v14  ;;  %v152_v33 = vpop.eup %151  ;;  %v56_v34 = vmul.f32 0.6931472, %v150_v26 }
  0x47   :  { %v94_v20 = vsub.f32 %v38_v13, %v84_v17  ;;  %v85_v22 = vsel %vm81_vm1, %v148_v15, %v83_v19  ;;  %v65_v43 = vmul.f32 0.6931472, %v152_v33 }
  0x48   :  { %v95_v25 = vsub.f32 %v39_v18, %v85_v22  ;;  %v62_v45 = vsel %vm61_vm2, %v59_v35, %v56_v34 }
  0x49   :  { %v96_v24 = vand.u32 2147483647, %v94_v20  ;;  %v72_v49 = vadd.f32 %v62_v45, %v52_v41  ;;  %v71_v51 = vsel %vm70_vm3, %v68_v44, %v65_v43 }
  0x4a   :  { %v97_v32 = vand.u32 2147483647, %v95_v25  ;;  %v73_v55 = vadd.f32 %v71_v51, %v53_v46 }
  0x4b   :  { %153 = vrsqrt.f32 %v96_v24  ;;  %vm100_vm4 = vcmp.eq.f32.partialorder %v96_v24, inf  ;;  %v103_v53 = vand.u32 2147483648, %v96_v24  ;;  %vm102_vm5 = vcmp.eq.f32.partialorder %v96_v24, 0.0 }
  0x4c   :  { %155 = vrsqrt.f32 %v97_v32  ;;  %v114_v59 = vmul.f32 %v92_v50, %v72_v49  ;;  %vm107_vm6 = vcmp.eq.f32.partialorder %v97_v32, inf  ;;  %v110_v60 = vand.u32 2147483648, %v97_v32 }
  0x4d   :  { %vm109_vm7 = vcmp.eq.f32.partialorder %v97_v32, 0.0  ;;  %v115_v1 = vmul.f32 %v93_v56, %v73_v55 }
  0x55   :  { %v154_v52 = vpop.eup %153 }
  0x56   :  { %v99_v54 = vmul.f32 %v154_v52, %v96_v24  ;;  %v156_v57 = vpop.eup %155 }
  0x57   :  { %v106_v62 = vmul.f32 %v156_v57, %v97_v32 }
  0x58   :  { %v101_v58 = vsel %vm100_vm4, %v96_v24, %v99_v54 }
  0x59   :  { %v104_v61 = vsel %vm102_vm5, %v103_v53, %v101_v58  ;;  %v108_v0 = vsel %vm107_vm6, %v97_v32, %v106_v62 }
  0x5a   :  { %v112_v63 = vmul.f32 %v104_v61, %v96_v24  ;;  %v111_v3 = vsel %vm109_vm7, %v110_v60, %v108_v0 }
  0x5b   :  { %v113_v4 = vmul.f32 %v111_v3, %v97_v32 }
  0x5c   :  { %v116_v2 = vmul.f32 %v114_v59, %v112_v63 }
  0x5d   :  { %v117_v5 = vmul.f32 %v115_v1, %v113_v4 }
  0x5e   :  { %120 = vst [vmem:[#allocation7] sm:$0xff] %v116_v2 }
  0x5f   :  { %121 = vst [vmem:[#allocation7 + $0x8] sm:$0xff] %v117_v5 }
  0x60   :  { %212 = shalt.err (!%p209_p6)
}
  0x61   :  { %s213_s8 = scalar_lea.hbm %s285_s2, 256 }
  0x62   :  { %p214_p7 = scmp.ne.s32.totalorder %s285_s2, %s213_s8  ;;  %p217_p8 = scmp.lt.u32.totalorder %s213_s8, %s285_s2 }
  0x64   :  { %p219_p9 = pnand %p217_p8, %p214_p7 }
  0x66   :  { %222 = shalt.err (!%p219_p9)
}
  0x67   :  { %131 = dma.vmem_to_hbm [thread:$0]  %s129_s4, 256, %s285_s2, [#allocation4]  }
  0x68   :  { %227 = dma.done.wait [#allocation4], 256  }
  0x69   :  { %228 = vsyncadd [#allocation4], 4294967040 }
  0x6a   :  { %135 = vsyncpa [#allocation3], 1 }
  0x6b   :  { %136 = vsyncpa [#allocation6], 1 }
  0x6c   :  { %137 = vsyncpa [#allocation4], 1 }

</bundles_post_ra>
